<compile_context>
chip_gen: v6e
topology: v6e:2x2x1
jax: 0.10.0
libtpu: 0.0.40
codegen_flags: <defaults>
</compile_context>

<pallas_src>
import functools
from typing import NamedTuple, Tuple

import jax
import jax.numpy as jnp
from jax.experimental import pallas as pl
from jax.experimental.pallas import tpu as pltpu


# ---------------------------------------------------------------------------
# Pallas kernel: fused cosine similarity for all e-layers + bootstrap loss
# ---------------------------------------------------------------------------
def _dual_prompt_cos_kernel(bounds_ref, q_ref, kn_ref, cos_ref, loss_ref,
                            *, n_e, B, pool):
    # bounds_ref : SMEM (2,) int32 = [lo, hi]            (scalar prefetch)
    # q_ref      : VMEM (n_e, B, key_d) f32   raw (un-normalised) queries
    # kn_ref     : VMEM (n_e, key_d, pool) f32 pre-L2-normalised, pre-transposed keys
    # cos_ref    : VMEM (n_e, B, pool) f32     per-layer cosine similarities
    # loss_ref   : SMEM (1, 1) f32             sum_l sum(1 - cos_l[:, lo:hi])
    lo = bounds_ref[0]
    hi = bounds_ref[1]

    # Bootstrap window mask over pool columns [lo, hi) (dynamic, from SMEM).
    # NOTE: if hi > pool this silently clips, matching Python slice semantics.
    col = jax.lax.broadcasted_iota(jnp.int32, (B, pool), dimension=1)
    in_window = (col >= lo) & (col < hi)

    total = jnp.zeros((), jnp.float32)
    # n_e is small & static -> unrolled; each layer is one small MXU matmul.
    for i in range(n_e):
        q = q_ref[i]                                         # (B, key_d)
        # F.normalize(q, dim=-1): q / max(||q||, 1e-12) == q * rsqrt(max(ssq, 1e-24))
        ssq = jnp.sum(q * q, axis=-1, keepdims=True)
        qn = q * jax.lax.rsqrt(jnp.maximum(ssq, 1e-24))
        # Keys are already normalised + transposed -> plain matmul gives cosine.
        blk = jnp.dot(qn, kn_ref[i], preferred_element_type=jnp.float32)   # (B, pool)
        total = total + jnp.sum(jnp.where(in_window, 1.0 - blk, 0.0))
        cos_ref[i] = blk                                     # direct store, no concat
    loss_ref[0, 0] = total


def dual_prompt_cos_pallas(Q, KN, lo, hi):
    """Q : (n_e, B, key_d) f32 raw queries (layer-major),
    KN: (n_e, key_d, pool) f32 pre-normalised keys.
    Returns cos (n_e, B, pool) f32 and the bootstrap-loss scalar f32."""
    n_e, B, key_d = Q.shape
    pool = KN.shape[-1]
    bounds = jnp.stack([lo, hi]).astype(jnp.int32)
    kernel = functools.partial(_dual_prompt_cos_kernel, n_e=n_e, B=B, pool=pool)
    cos3, loss = pl.pallas_call(
        kernel,
        grid_spec=pltpu.PrefetchScalarGridSpec(
            num_scalar_prefetch=1,
            grid=(1,),
            in_specs=[
                pl.BlockSpec((n_e, B, key_d), lambda i, b: (0, 0, 0)),
                pl.BlockSpec((n_e, key_d, pool), lambda i, b: (0, 0, 0)),
            ],
            out_specs=[
                pl.BlockSpec((n_e, B, pool), lambda i, b: (0, 0, 0)),
                pl.BlockSpec(memory_space=pltpu.MemorySpace.SMEM),
            ],
        ),
        out_shape=[
            jax.ShapeDtypeStruct((n_e, B, pool), jnp.float32),
            jax.ShapeDtypeStruct((1, 1), jnp.float32),
        ],
        # single-step grid: nothing to shard across cores for a ~us kernel
        compiler_params=pltpu.CompilerParams(dimension_semantics=("arbitrary",)),
    )(bounds, Q, KN)
    return cos3, loss[0, 0]


# ---------------------------------------------------------------------------
# Jitted forward implementation (whole e-layer path under one jit)
# ---------------------------------------------------------------------------
class _Cfg(NamedTuple):
    e_layers: Tuple[int, ...]        # sorted; matches kn_all / e_p_all stacking
    g_layers: Tuple[int, ...]        # matches g_p_tuple order
    top_k: int
    e_p_length: int
    emb_d: int
    e_pool_size: int
    loss_weight: float
    task_id_bootstrap: bool
    train: bool


@functools.partial(jax.jit, static_argnames=("cfg",))
def _dual_prompt_forward(x_query, task_count, kn_all, e_p_all, g_p_tuple, *, cfg):
    B, nL, _ = x_query.shape
    top_k = cfg.top_k
    pool = cfg.e_pool_size
    lo = task_count * top_k          # traced -> no recompile across task counts
    hi = lo + top_k

    e_present = tuple(l for l in cfg.e_layers if l < nL)
    n_e = len(e_present)

    cos3 = None
    boot_loss = jnp.float32(0.0)
    if n_e > 0:
        # Gather + layer-major transpose fuse into the single operand copy that
        # feeds the pallas_call (we are inside jit) -> no extra HBM round trip.
        q_sel = x_query[:, jnp.asarray(e_present), :].astype(jnp.float32)   # (B, n_e, key_d)
        Q = jnp.transpose(q_sel, (1, 0, 2))                                  # (n_e, B, key_d)
        if n_e == len(cfg.e_layers):
            KN = kn_all
        else:
            KN = kn_all[jnp.asarray([cfg.e_layers.index(l) for l in e_present])]
        cos3, boot_loss = dual_prompt_cos_pallas(Q, KN, lo, hi)

    p_return = []
    p_loss = jnp.float32(0.0)
    for l in range(nL):
        lp = []
        if l in e_present:
            i = e_present.index(l)
            cos = cos3[i]                                        # (B, pool)
            p = e_p_all[cfg.e_layers.index(l)]                   # (pool, e_p_len, emb_d)
            if cfg.train:
                if cfg.task_id_bootstrap:
                    # per-layer sum(1 - cos[:, lo:hi]) already accumulated into a
                    # single SMEM scalar inside the Pallas kernel (boot_loss).
                    # NOTE: dynamic_slice clamps when hi > pool (vs shrinking in
                    # PyTorch); identical whenever the slice is in bounds.
                    p_slice = jax.lax.dynamic_slice_in_dim(p, lo, top_k, axis=0)
                    P_ = jnp.broadcast_to(
                        p_slice.reshape(top_k * cfg.e_p_length, cfg.emb_d)[None],
                        (B, top_k * cfg.e_p_length, cfg.emb_d))
                else:
                    k_idx = jax.lax.top_k(cos, top_k)[1]
                    # mirrors the original PyTorch fancy-indexing quirk
                    # (cos[:, k_idx] -> (B, B, top_k)); kept for parity.
                    p_loss = p_loss + jnp.sum(1.0 - jnp.take(cos, k_idx, axis=1))
                    P_ = p[k_idx]
            else:
                k_idx = jax.lax.top_k(cos, top_k)[1]
                P_ = p[k_idx]                                    # (B, top_k, e_p_len, emb_d)
            lp.append(P_)
        if l in cfg.g_layers:
            gp = g_p_tuple[cfg.g_layers.index(l)]
            lp.append(jnp.broadcast_to(gp[None], (B,) + gp.shape))
        p_return.append(jnp.concatenate(lp, axis=1))

    if cfg.train and cfg.task_id_bootstrap and n_e > 0:
        p_loss = p_loss + boot_loss

    return tuple(p_return), p_loss * cfg.loss_weight


# ---------------------------------------------------------------------------
# DualPrompt module (JAX port, deterministic init mimicking tensor_prompt)
# ---------------------------------------------------------------------------
class DualPrompt:
    def __init__(self, emb_d, n_tasks, e_pool_size, num_e_prompts, num_g_prompts,
                 e_layers, g_layers, loss_weight, topk, vis_period,
                 key_dim=768, seed=0):
        self.task_count = 0
        self.emb_d = emb_d
        self.key_d = key_dim
        self.n_tasks = n_tasks
        self.top_k = topk
        self.loss_weight = loss_weight
        self.vis_period = vis_period
        # _init_smart
        self.task_id_bootstrap = True
        self.g_layers = tuple(g_layers)
        self.e_layers = tuple(e_layers)
        self.g_p_length = num_g_prompts
        self.e_p_length = num_e_prompts
        self.e_pool_size = e_pool_size

        # tensor_prompt(..., ortho=False) -> uniform_(0, 1)
        key = jax.random.PRNGKey(seed)
        self.g_p = {}
        self.e_p = {}
        self.e_k = {}
        for g in self.g_layers:
            key, sub = jax.random.split(key)
            self.g_p[g] = jax.random.uniform(sub, (self.g_p_length, emb_d),
                                             dtype=jnp.float32)
        for e in self.e_layers:
            key, sub_p, sub_k = jax.random.split(key, 3)
            self.e_p[e] = jax.random.uniform(
                sub_p, (self.e_pool_size, self.e_p_length, emb_d), dtype=jnp.float32)
            self.e_k[e] = jax.random.uniform(
                sub_k, (self.e_pool_size, self.key_d), dtype=jnp.float32)

        # --- precomputed, layer-sorted stacks (built once, review items 2/3) ---
        self._e_layers_sorted = tuple(sorted(self.e_layers))
        self._g_layers_order = tuple(self.g_layers)
        if self._e_layers_sorted:
            kn_list, ep_list = [], []
            for l in self._e_layers_sorted:
                k = self.e_k[l]                              # (pool, key_d)
                kn = k / jnp.maximum(
                    jnp.linalg.norm(k, axis=-1, keepdims=True), 1e-12)
                kn_list.append(kn.T)                         # (key_d, pool)
                ep_list.append(self.e_p[l])
            self._kn_all = jnp.stack(kn_list, axis=0)        # (n_e, key_d, pool)
            self._e_p_all = jnp.stack(ep_list, axis=0)       # (n_e, pool, len, emb_d)
        else:
            self._kn_all = jnp.zeros((1, 1, 1), jnp.float32)
            self._e_p_all = jnp.zeros((1, 1, 1, 1), jnp.float32)
        self._g_p_tuple = tuple(self.g_p[l] for l in self._g_layers_order)

    def process_task_count(self, task_id):
        self.task_count = task_id

    def _cfg(self, train):
        return _Cfg(
            e_layers=self._e_layers_sorted,
            g_layers=self._g_layers_order,
            top_k=self.top_k,
            e_p_length=self.e_p_length,
            emb_d=self.emb_d,
            e_pool_size=self.e_pool_size,
            loss_weight=float(self.loss_weight),
            task_id_bootstrap=bool(self.task_id_bootstrap),
            train=bool(train),
        )

    def forward(self, x_query, vis_mark, train=False, task_id=None):
        p_return, p_loss = _dual_prompt_forward(
            x_query, jnp.int32(self.task_count),
            self._kn_all, self._e_p_all, self._g_p_tuple,
            cfg=self._cfg(train))
        # TODO(synk): training-time heatmap visualization (get_event_storage /
        # mat_heatmap / put_image) has no Pallas/JAX equivalent; skipped.
        return list(p_return), p_loss


# ---------------------------------------------------------------------------
# demo / self-check
# ---------------------------------------------------------------------------
def _reference_forward(model, x_query, train=True):
    """Pure-JAX reference (no Pallas) used only to validate the kernel."""
    B, nL, C = x_query.shape
    lo = model.task_count * model.top_k
    hi = (model.task_count + 1) * model.top_k
    p_return, p_loss = [], jnp.float32(0.0)

    def normalize(x):
        return x / jnp.maximum(jnp.linalg.norm(x, axis=-1, keepdims=True), 1e-12)

    for l in range(nL):
        lp = []
        if l in model.e_layers:
            nK = normalize(model.e_k[l])
            q = normalize(x_query[:, l, :])
            cos = jnp.einsum('bj,kj->bk', q, nK)
            if train and model.task_id_bootstrap:
                p_loss = p_loss + jnp.sum(1.0 - cos[:, lo:hi])
                P_ = jnp.broadcast_to(
                    model.e_p[l][lo:hi].reshape(-1, model.emb_d)[None],
                    (B, (hi - lo) * model.e_p_length, model.emb_d))
            else:
                k_idx = jax.lax.top_k(cos, model.top_k)[1]
                P_ = model.e_p[l][k_idx]
            lp.append(P_)
        if l in model.g_layers:
            gp = model.g_p[l]
            lp.append(jnp.broadcast_to(gp[None], (B,) + gp.shape))
        p_return.append(jnp.concatenate(lp, axis=1))
    return p_return, p_loss * model.loss_weight


if __name__ == "__main__":
    B, nL = 2, 5
    emb_d, key_dim = 32, 32
    model = DualPrompt(
        emb_d=emb_d, n_tasks=4, e_pool_size=8, num_e_prompts=4, num_g_prompts=2,
        e_layers=(2, 3, 4), g_layers=(0, 1),
        loss_weight=0.5, topk=2, vis_period=0, key_dim=key_dim, seed=0)

    x_query = jax.random.normal(jax.random.PRNGKey(0), (B, nL, key_dim),
                                dtype=jnp.float32)

    # bootstrap training path, two task counts (same compiled function: the
    # task count is a traced int32, not baked into the kernel/jit).
    for tc in (1, 0):
        model.process_task_count(tc)
        p_return, p_loss = model.forward(x_query, vis_mark="demo", train=True)
        p_return = [jax.block_until_ready(p) for p in p_return]
        p_loss = jax.block_until_ready(p_loss)

        ref_return, ref_loss = _reference_forward(model, x_query, train=True)
        # loss tolerance allows for MXU f32 matmul pass decomposition
        assert jnp.allclose(p_loss, ref_loss, rtol=1e-2, atol=1e-2), (
            tc, p_loss, ref_loss)
        for a, b in zip(p_return, ref_return):
            assert a.shape == b.shape
            assert jnp.allclose(a, b, atol=1e-5)

    # eval path (top-k gather) — exercise it and sanity-check shapes.
    model.process_task_count(1)
    eval_return, _ = model.forward(x_query, vis_mark="demo", train=False)
    eval_return = [jax.block_until_ready(p) for p in eval_return]
    for l in model.e_layers:
        assert eval_return[l].shape == (B, model.top_k, model.e_p_length, emb_d)

    print("KERNEL_OK")
</pallas_src>

<mosaic_0001>
module attributes {stable_mosaic.version = 11 : i64} {
  func.func @_dual_prompt_cos_kernel(%arg0: i32, %arg1: memref<2xi32, #tpu.memory_space<smem>>, %arg2: memref<3x2x32xf32, #tpu.memory_space<vmem>>, %arg3: memref<3x32x8xf32, #tpu.memory_space<vmem>>, %arg4: memref<3x2x8xf32, #tpu.memory_space<vmem>>, %arg5: memref<1x1xf32, #tpu.memory_space<smem>>) attributes {dimension_semantics = [#tpu.dimension_semantics<arbitrary>], iteration_bounds = array<i64: 1>, scalar_prefetch = 1 : i64, scratch_operands = 0 : i64, tpu.core_type = #tpu.core_type<tc>, window_params = [{pipeline_mode = #tpu.pipeline_mode<synchronous>, transform_indices = @transform_0, window_bounds = array<i64: 3, 2, 32>}, {pipeline_mode = #tpu.pipeline_mode<synchronous>, transform_indices = @transform_1, window_bounds = array<i64: 3, 32, 8>}, {pipeline_mode = #tpu.pipeline_mode<synchronous>, transform_indices = @transform_2, window_bounds = array<i64: 3, 2, 8>}, {transform_indices = @transform_3, window_bounds = array<i64: 1, 1>}]} {
    %c0 = arith.constant 0 : index
    %0 = memref.load %arg1[%c0] : memref<2xi32, #tpu.memory_space<smem>>
    %c1 = arith.constant 1 : index
    %1 = memref.load %arg1[%c1] : memref<2xi32, #tpu.memory_space<smem>>
    %2 = tpu.iota {dimensions = array<i32: 1>} : vector<2x8xi32>
    %3 = vector.broadcast %0 : i32 to vector<2x8xi32>
    %4 = arith.cmpi sge, %2, %3 : vector<2x8xi32>
    %5 = vector.broadcast %1 : i32 to vector<2x8xi32>
    %6 = arith.cmpi slt, %2, %5 : vector<2x8xi32>
    %7 = arith.andi %4, %6 : vector<2x8xi1>
    %c0_0 = arith.constant 0 : index
    %c0_1 = arith.constant 0 : index
    %c0_2 = arith.constant 0 : index
    %8 = vector.load %arg2[%c0_0, %c0_1, %c0_2] : memref<3x2x32xf32, #tpu.memory_space<vmem>>, vector<1x2x32xf32>
    %9 = vector.shape_cast %8 : vector<1x2x32xf32> to vector<2x32xf32>
    %10 = arith.mulf %9, %9 : vector<2x32xf32>
    %cst = arith.constant dense<0.000000e+00> : vector<2xf32>
    %11 = vector.multi_reduction <add>, %10, %cst [1] : vector<2x32xf32> to vector<2xf32>
    %12 = vector.shape_cast %11 : vector<2xf32> to vector<2x1xf32>
    %cst_3 = arith.constant 1.000000e-24 : f32
    %13 = vector.broadcast %cst_3 : f32 to vector<2x1xf32>
    %14 = arith.maximumf %12, %13 : vector<2x1xf32>
    %15 = math.rsqrt %14 : vector<2x1xf32>
    %16 = vector.broadcast %15 : vector<2x1xf32> to vector<2x32xf32>
    %17 = arith.mulf %9, %16 : vector<2x32xf32>
    %c0_4 = arith.constant 0 : index
    %c0_5 = arith.constant 0 : index
    %c0_6 = arith.constant 0 : index
    %18 = vector.load %arg3[%c0_4, %c0_5, %c0_6] : memref<3x32x8xf32, #tpu.memory_space<vmem>>, vector<1x32x8xf32>
    %19 = vector.shape_cast %18 : vector<1x32x8xf32> to vector<32x8xf32>
    %cst_7 = arith.constant dense<0.000000e+00> : vector<2x8xf32>
    %20 = tpu.matmul %17, %19, %cst_7 {dimension_numbers = #tpu.dot_dimension_numbers<[1], [0], [0], [1], [0, 0, 1, 1], [], []>} : vector<2x32xf32>, vector<32x8xf32>, vector<2x8xf32> -> vector<2x8xf32>
    %cst_8 = arith.constant 1.000000e+00 : f32
    %21 = vector.broadcast %cst_8 : f32 to vector<2x8xf32>
    %22 = arith.subf %21, %20 : vector<2x8xf32>
    %cst_9 = arith.constant 0.000000e+00 : f32
    %23 = vector.broadcast %cst_9 : f32 to vector<2x8xf32>
    %24 = arith.select %7, %22, %23 : vector<2x8xi1>, vector<2x8xf32>
    %25 = vector.shape_cast %24 : vector<2x8xf32> to vector<1x2x8xf32>
    %cst_10 = arith.constant dense<0.000000e+00> : vector<1xf32>
    %26 = vector.multi_reduction <add>, %25, %cst_10 [1, 2] : vector<1x2x8xf32> to vector<1xf32>
    %27 = vector.shape_cast %26 : vector<1xf32> to vector<1x1x1xf32>
    %28 = vector.extract %27[0, 0, 0] : f32 from vector<1x1x1xf32>
    %cst_11 = arith.constant 0.000000e+00 : f32
    %29 = arith.addf %cst_11, %28 : f32
    %c0_12 = arith.constant 0 : index
    %c0_13 = arith.constant 0 : index
    %c0_14 = arith.constant 0 : index
    %30 = vector.load %arg4[%c0_12, %c0_13, %c0_14] : memref<3x2x8xf32, #tpu.memory_space<vmem>>, vector<1x2x8xf32>
    %31 = vector.shape_cast %30 : vector<1x2x8xf32> to vector<2x8xf32>
    %32 = vector.shape_cast %20 : vector<2x8xf32> to vector<1x2x8xf32>
    tpu.vector_store %arg4[%c0_12, %c0_13, %c0_14], %32 {strides = array<i32>} : memref<3x2x8xf32, #tpu.memory_space<vmem>>, vector<1x2x8xf32>,
    %c1_15 = arith.constant 1 : index
    %c0_16 = arith.constant 0 : index
    %c0_17 = arith.constant 0 : index
    %33 = vector.load %arg2[%c1_15, %c0_16, %c0_17] : memref<3x2x32xf32, #tpu.memory_space<vmem>>, vector<1x2x32xf32>
    %34 = vector.shape_cast %33 : vector<1x2x32xf32> to vector<2x32xf32>
    %35 = arith.mulf %34, %34 : vector<2x32xf32>
    %cst_18 = arith.constant dense<0.000000e+00> : vector<2xf32>
    %36 = vector.multi_reduction <add>, %35, %cst_18 [1] : vector<2x32xf32> to vector<2xf32>
    %37 = vector.shape_cast %36 : vector<2xf32> to vector<2x1xf32>
    %cst_19 = arith.constant 1.000000e-24 : f32
    %38 = vector.broadcast %cst_19 : f32 to vector<2x1xf32>
    %39 = arith.maximumf %37, %38 : vector<2x1xf32>
    %40 = math.rsqrt %39 : vector<2x1xf32>
    %41 = vector.broadcast %40 : vector<2x1xf32> to vector<2x32xf32>
    %42 = arith.mulf %34, %41 : vector<2x32xf32>
    %c1_20 = arith.constant 1 : index
    %c0_21 = arith.constant 0 : index
    %c0_22 = arith.constant 0 : index
    %43 = vector.load %arg3[%c1_20, %c0_21, %c0_22] : memref<3x32x8xf32, #tpu.memory_space<vmem>>, vector<1x32x8xf32>
    %44 = vector.shape_cast %43 : vector<1x32x8xf32> to vector<32x8xf32>
    %cst_23 = arith.constant dense<0.000000e+00> : vector<2x8xf32>
    %45 = tpu.matmul %42, %44, %cst_23 {dimension_numbers = #tpu.dot_dimension_numbers<[1], [0], [0], [1], [0, 0, 1, 1], [], []>} : vector<2x32xf32>, vector<32x8xf32>, vector<2x8xf32> -> vector<2x8xf32>
    %cst_24 = arith.constant 1.000000e+00 : f32
    %46 = vector.broadcast %cst_24 : f32 to vector<2x8xf32>
    %47 = arith.subf %46, %45 : vector<2x8xf32>
    %cst_25 = arith.constant 0.000000e+00 : f32
    %48 = vector.broadcast %cst_25 : f32 to vector<2x8xf32>
    %49 = arith.select %7, %47, %48 : vector<2x8xi1>, vector<2x8xf32>
    %50 = vector.shape_cast %49 : vector<2x8xf32> to vector<1x2x8xf32>
    %cst_26 = arith.constant dense<0.000000e+00> : vector<1xf32>
    %51 = vector.multi_reduction <add>, %50, %cst_26 [1, 2] : vector<1x2x8xf32> to vector<1xf32>
    %52 = vector.shape_cast %51 : vector<1xf32> to vector<1x1x1xf32>
    %53 = vector.extract %52[0, 0, 0] : f32 from vector<1x1x1xf32>
    %54 = arith.addf %29, %53 : f32
    %c1_27 = arith.constant 1 : index
    %c0_28 = arith.constant 0 : index
    %c0_29 = arith.constant 0 : index
    %55 = vector.load %arg4[%c1_27, %c0_28, %c0_29] : memref<3x2x8xf32, #tpu.memory_space<vmem>>, vector<1x2x8xf32>
    %56 = vector.shape_cast %55 : vector<1x2x8xf32> to vector<2x8xf32>
    %57 = vector.shape_cast %45 : vector<2x8xf32> to vector<1x2x8xf32>
    tpu.vector_store %arg4[%c1_27, %c0_28, %c0_29], %57 {strides = array<i32>} : memref<3x2x8xf32, #tpu.memory_space<vmem>>, vector<1x2x8xf32>,
    %c2 = arith.constant 2 : index
    %c0_30 = arith.constant 0 : index
    %c0_31 = arith.constant 0 : index
    %58 = vector.load %arg2[%c2, %c0_30, %c0_31] : memref<3x2x32xf32, #tpu.memory_space<vmem>>, vector<1x2x32xf32>
    %59 = vector.shape_cast %58 : vector<1x2x32xf32> to vector<2x32xf32>
    %60 = arith.mulf %59, %59 : vector<2x32xf32>
    %cst_32 = arith.constant dense<0.000000e+00> : vector<2xf32>
    %61 = vector.multi_reduction <add>, %60, %cst_32 [1] : vector<2x32xf32> to vector<2xf32>
    %62 = vector.shape_cast %61 : vector<2xf32> to vector<2x1xf32>
    %cst_33 = arith.constant 1.000000e-24 : f32
    %63 = vector.broadcast %cst_33 : f32 to vector<2x1xf32>
    %64 = arith.maximumf %62, %63 : vector<2x1xf32>
    %65 = math.rsqrt %64 : vector<2x1xf32>
    %66 = vector.broadcast %65 : vector<2x1xf32> to vector<2x32xf32>
    %67 = arith.mulf %59, %66 : vector<2x32xf32>
    %c2_34 = arith.constant 2 : index
    %c0_35 = arith.constant 0 : index
    %c0_36 = arith.constant 0 : index
    %68 = vector.load %arg3[%c2_34, %c0_35, %c0_36] : memref<3x32x8xf32, #tpu.memory_space<vmem>>, vector<1x32x8xf32>
    %69 = vector.shape_cast %68 : vector<1x32x8xf32> to vector<32x8xf32>
    %cst_37 = arith.constant dense<0.000000e+00> : vector<2x8xf32>
    %70 = tpu.matmul %67, %69, %cst_37 {dimension_numbers = #tpu.dot_dimension_numbers<[1], [0], [0], [1], [0, 0, 1, 1], [], []>} : vector<2x32xf32>, vector<32x8xf32>, vector<2x8xf32> -> vector<2x8xf32>
    %cst_38 = arith.constant 1.000000e+00 : f32
    %71 = vector.broadcast %cst_38 : f32 to vector<2x8xf32>
    %72 = arith.subf %71, %70 : vector<2x8xf32>
    %cst_39 = arith.constant 0.000000e+00 : f32
    %73 = vector.broadcast %cst_39 : f32 to vector<2x8xf32>
    %74 = arith.select %7, %72, %73 : vector<2x8xi1>, vector<2x8xf32>
    %75 = vector.shape_cast %74 : vector<2x8xf32> to vector<1x2x8xf32>
    %cst_40 = arith.constant dense<0.000000e+00> : vector<1xf32>
    %76 = vector.multi_reduction <add>, %75, %cst_40 [1, 2] : vector<1x2x8xf32> to vector<1xf32>
    %77 = vector.shape_cast %76 : vector<1xf32> to vector<1x1x1xf32>
    %78 = vector.extract %77[0, 0, 0] : f32 from vector<1x1x1xf32>
    %79 = arith.addf %54, %78 : f32
    %c2_41 = arith.constant 2 : index
    %c0_42 = arith.constant 0 : index
    %c0_43 = arith.constant 0 : index
    %80 = vector.load %arg4[%c2_41, %c0_42, %c0_43] : memref<3x2x8xf32, #tpu.memory_space<vmem>>, vector<1x2x8xf32>
    %81 = vector.shape_cast %80 : vector<1x2x8xf32> to vector<2x8xf32>
    %82 = vector.shape_cast %70 : vector<2x8xf32> to vector<1x2x8xf32>
    tpu.vector_store %arg4[%c2_41, %c0_42, %c0_43], %82 {strides = array<i32>} : memref<3x2x8xf32, #tpu.memory_space<vmem>>, vector<1x2x8xf32>,
    %c0_44 = arith.constant 0 : index
    %c0_45 = arith.constant 0 : index
    %83 = memref.load %arg5[%c0_44, %c0_45] : memref<1x1xf32, #tpu.memory_space<smem>>
    memref.store %79, %arg5[%c0_44, %c0_45] : memref<1x1xf32, #tpu.memory_space<smem>>
    return
  }
  func.func @transform_0(%arg0: i32, %arg1: memref<2xi32, #tpu.memory_space<smem>>) -> (i32, i32, i32) {
    %c0_i32 = arith.constant 0 : i32
    %c0_i32_0 = arith.constant 0 : i32
    %c0_i32_1 = arith.constant 0 : i32
    %c0_i32_2 = arith.constant 0 : i32
    return %c0_i32, %c0_i32_0, %c0_i32_1 : i32, i32, i32
  }
  func.func @transform_1(%arg0: i32, %arg1: memref<2xi32, #tpu.memory_space<smem>>) -> (i32, i32, i32) {
    %c0_i32 = arith.constant 0 : i32
    %c0_i32_0 = arith.constant 0 : i32
    %c0_i32_1 = arith.constant 0 : i32
    %c0_i32_2 = arith.constant 0 : i32
    return %c0_i32, %c0_i32_0, %c0_i32_1 : i32, i32, i32
  }
  func.func @transform_2(%arg0: i32, %arg1: memref<2xi32, #tpu.memory_space<smem>>) -> (i32, i32, i32) {
    %c0_i32 = arith.constant 0 : i32
    %c0_i32_0 = arith.constant 0 : i32
    %c0_i32_1 = arith.constant 0 : i32
    %c0_i32_2 = arith.constant 0 : i32
    return %c0_i32, %c0_i32_0, %c0_i32_1 : i32, i32, i32
  }
  func.func @transform_3(%arg0: i32, %arg1: memref<2xi32, #tpu.memory_space<smem>>) -> (i32, i32) {
    %c0_i32 = arith.constant 0 : i32
    %c0_i32_0 = arith.constant 0 : i32
    %c0_i32_1 = arith.constant 0 : i32
    return %c0_i32, %c0_i32_0 : i32, i32
  }
}

</mosaic_0001>

<bundles_post_ra>
// kernel: _dual_prompt_forward.1
= control target key start
LH: loop header
LB: loop body
LE: loop exit
PB: predicated region body
PF: predicated region fallthrough
CT: control target
= control target key end

     0   :  { %s608_s0 = inlined_call_operand.vmem [shape: s32[2], index: 0, kind: input, shape index: {}]   ;;  %s609_s1 = inlined_call_operand.vmem [shape: f32[3,2,32], index: 1, kind: input, shape index: {}]   ;;  %s610_s2 = inlined_call_operand.vmem [shape: f32[3,32,8], index: 2, kind: input, shape index: {}]   ;;  %s611_s3 = inlined_call_operand.hbm [shape: f32[3,2,8], index: 3, kind: output, shape index: {0}]   ;;  %s612_s4 = inlined_call_operand.hbm [shape: f32[1,1], index: 4, kind: output, shape index: {1}]  }
   0x1   :  { %s10_s17 = sshll.u32 %s608_s0, 4  ;;  %s11_s17 = int_to_ptr.vmem [resolvable:$true] %s10_s17 }
   0x2   :  { %s449_s18 = scalar_lea.vmem %s11_s17, 16  ;;  %p454_p1 = scmp.lt.s32.totalorder %s11_s17, %s11_s17 }
   0x3   :  { %p450_p0 = scmp.ne.s32.totalorder %s11_s17, %s449_s18  ;;  %p455_p2 = scmp.lt.s32.totalorder %s449_s18, %s449_s18 }
   0x5   :  { %p456_p3 = por %p455_p2, %p454_p1 }
   0x7   :  { %p457_p4 = pnand %p456_p3, %p450_p0 }
   0x9   :  { %460 = shalt.err (!%p457_p4)  }
   0xa   :  { %s495_s19 = smov [#allocation3]  }
   0xb   :  { %13 = dma.vmem_to_smem %s11_s17, 16, %s495_s19, [#allocation2] }
   0xc   :  { %489 = dma.done.wait [#allocation2], 16 }
   0xd   :  { %490 = vsyncadd [#allocation2], 4294967280 }
   0xe   :  { %15 = sfence }
   0xf   :  { %16 = vsyncpa [#allocation5], 0  ;;  %v31_v0 = vld [vmem:[%s609_s1] sm:$0x3]  ;;  %vm33_vm0 = vcmask 254976  }
  0x10   :  { %v370_v1 = vld [vmem:[%s609_s1 + $0x2] sm:$0x3]  ;;  %v32_v2 = vmul.f32 %v31_v0, %v31_v0  ;;  %v539_v4 = vld [vmem:[%s609_s1 + $0x4] sm:$0x3] }
  0x11   :  { %v135_v3 = vmul.f32 %v370_v1, %v370_v1 }
  0x12   :  { %17 = vsyncpa [#allocation6], 0  ;;  %v237_v5 = vmul.f32 %v539_v4, %v539_v4  ;;  %v34_v6 = vsel %vm33_vm0, %v32_v2, 0.0  ;;  %v43_v9 = vld [vmem:[%s610_s2 + $0x18] sm:$0xff]  ;;  %v496_v10 = vmov 0.0   ;;  %v42_v11 = vld [vmem:[%s610_s2 + $0x10] sm:$0xff]  ;;  %v24_v34 = vlaneseq }
  0x13   :  { %35 = vadd.xlane.f32.xlu0 %v34_v6  ;;  %v136_v8 = vsel %vm33_vm0, %v135_v3, 0.0  ;;  %397 = vmatprep.subr.mxu0 %v496_v10  ;;  %v374_v12 = vld [vmem:[%s610_s2 + $0x38] sm:$0xff]  ;;  %v373_v13 = vld [vmem:[%s610_s2 + $0x30] sm:$0xff]  ;;  %v41_v14 = vld [vmem:[%s610_s2 + $0x8] sm:$0xff]  ;;  %vm497_vm1 = vmmov 0   ;;  %vm44_vm2 = vcmask 261120  }
  0x14   :  { %v238_v7 = vsel %vm33_vm0, %v237_v5, 0.0  ;;  %408 = vmatprep.subr.mxu1 %v496_v10  ;;  %398 = vmatpush3.msra.mxu0 %v43_v9  ;;  %v40_v15 = vld [vmem:[%s610_s2] sm:$0xff]  ;;  %v372_v16 = vld [vmem:[%s610_s2 + $0x28] sm:$0xff]  ;;  %v380_v26 = vld [vmem:[%s610_s2 + $0x58] sm:$0xff]  ;;  %s22_s0 = sld [smem:[#allocation3]]  ;;  %v25_v35 = vand.u32 127, %v24_v34 }
  0x15   :  { %239 = vadd.xlane.f32.xlu1 %v238_v7  ;;  %409 = vmatpush3.msra.mxu1 %v374_v12  ;;  %v371_v17 = vld [vmem:[%s610_s2 + $0x20] sm:$0xff]  ;;  %v379_v28 = vld [vmem:[%s610_s2 + $0x50] sm:$0xff]  ;;  %v378_v31 = vld [vmem:[%s610_s2 + $0x48] sm:$0xff]  ;;  %s368_s22 = sld [smem:[#allocation3 + $0x1]]  ;;  %vm120_vm5 = vcmask 58368  }
  0x16   :  { %399 = vmatprep.subr.mxu0 %v496_v10  ;;  %410 = vmatprep.subr.mxu1 %v496_v10  ;;  %v377_v32 = vld [vmem:[%s610_s2 + $0x40] sm:$0xff]  ;;  %s498_s2 = smov [#allocation4]  }
  0x17   :  { %137 = vadd.xlane.f32.xlu0 %v136_v8  ;;  %400 = vmatpush3.msra.mxu0 %v42_v11  ;;  %s344_s23 = sshll.u32 %s498_s2, 4  ;;  %s345_s23 = int_to_ptr.vmem [resolvable:$true] %s344_s23 }
  0x18   :  { %405 = vmatprep.mubr.msk.f32.mxu0 %vm497_vm1, %v496_v10  ;;  %401 = vmatprep.subr.mxu0 %v496_v10  ;;  %s461_s24 = scalar_lea.vmem %s345_s23, 96  ;;  %p466_p6 = scmp.lt.s32.totalorder %s345_s23, %s345_s23 }
  0x19   :  { %411 = vmatpush3.msra.mxu1 %v373_v13  ;;  %402 = vmatpush3.msra.mxu0 %v41_v14  ;;  %p462_p5 = scmp.ne.s32.totalorder %s345_s23, %s461_s24  ;;  %p467_p7 = scmp.lt.s32.totalorder %s461_s24, %s461_s24 }
  0x1a   :  { %412 = vmatprep.subr.mxu1 %v496_v10  ;;  %403 = vmatprep.subr.mxu0 %v496_v10  ;;  %v26_v36 = vstv %s22_s0 }
  0x1b   :  { %416 = vmatprep.mubr.msk.f32.mxu1 %vm497_vm1, %v496_v10  ;;  %404 = vmatpush3.msra.mxu0 %v40_v15  ;;  %v28_v37 = vstv %s368_s22  ;;  %vm27_vm3 = vcmp.ge.s32.totalorder %v25_v35, %v26_v36  ;;  %p468_p8 = por %p467_p7, %p466_p6 }
  0x1c   :  { %419 = vmatprep.subr.mxu0 %v496_v10  ;;  %413 = vmatpush3.msra.mxu1 %v372_v16  ;;  %vm29_vm4 = vcmp.lt.s32.totalorder %v25_v35, %v28_v37 }
  0x1d   :  { %414 = vmatprep.subr.mxu1 %v496_v10  ;;  %vm586_vm6 = vmand %vm27_vm3, %vm29_vm4  ;;  %p469_p9 = pnand %p468_p8, %p462_p5 }
  0x1e   :  { %415 = vmatpush3.msra.mxu1 %v371_v17 }
  0x9c   :  { %v36_v18 = vpop.xlane.xlu0 %35 }
  0x9d   :  { %v37_v19 = vmax.f32 %v36_v18, 1e-24 }
  0x9e   :  { %v240_v20 = vpop.xlane.xlu1 %239 }
  0x9f   :  { %v241_v21 = vmax.f32 %v240_v20, 1e-24  ;;  %443 = vrsqrt.f32 %v37_v19 }
  0xa0   :  { %v138_v22 = vpop.xlane.xlu0 %137 }
  0xa1   :  { %v139_v23 = vmax.f32 %v138_v22, 1e-24  ;;  %445 = vrsqrt.f32 %v241_v21 }
  0xa3   :  { %447 = vrsqrt.f32 %v139_v23 }
  0xac   :  { %v444_v24 = vpop.eup %443 }
  0xad   :  { %v39_v25 = vmul.f32 %v444_v24, %v31_v0 }
  0xae   :  { %v446_v27 = vpop.eup %445 }
  0xaf   :  { %406 = vmatmul.mubr.msk.f32.vlgmr.msra.gmra.mxu0 %vm44_vm2, %v39_v25  ;;  %v243_v33 = vmul.f32 %v446_v27, %v539_v4 }
  0xb0   :  { %v448_v29 = vpop.eup %447  ;;  %420 = vmatpush3.msra.mxu0 %v380_v26  ;;  %427 = vmatprep.mubr.msk.f32.mxu0 %vm497_vm1, %v496_v10 }
  0xb1   :  { %421 = vmatprep.subr.mxu0 %v496_v10  ;;  %v141_v30 = vmul.f32 %v448_v29, %v370_v1 }
  0xb2   :  { %422 = vmatpush3.msra.mxu0 %v379_v28 }
  0xb3   :  { %423 = vmatprep.subr.mxu0 %v496_v10  ;;  %417 = vmatmul.mubr.msk.f32.vlgmr.msra.gmra.mxu1 %vm44_vm2, %v141_v30 }
  0xb4   :  { %424 = vmatpush3.msra.mxu0 %v378_v31 }
  0xb5   :  { %425 = vmatprep.subr.mxu0 %v496_v10 }
  0xb6   :  { %426 = vmatpush3.msra.mxu0 %v377_v32 }
  0xb7   :  { %428 = vmatmul.mubr.msk.f32.vlgmr.msra.gmra.mxu0 %vm44_vm2, %v243_v33 }
 0x16f   :  { %v114_v38 = vpop.f32.mrf.mxu0 }
 0x170   :  { %v118_v40 = vsub.f32 1.0, %v114_v38  ;;  %132 = vst.msk [vmem:[#allocation4] sm:$0x3] %vm120_vm5, %v114_v38 }
 0x171   :  { %v407_v41 = vpop.f32.mrf.mxu0 }
 0x172   :  { %v119_v42 = vsel %vm586_vm6, %v118_v40, 0.0 }
 0x173   :  { %v216_v43 = vpop.f32.mrf.mxu1  ;;  %v121_v44 = vsel %vm120_vm5, %v119_v42, 0.0 }
 0x174   :  { %v220_v45 = vsub.f32 1.0, %v216_v43  ;;  %234 = vst.msk [vmem:[#allocation4 + $0x2] sm:$0x3] %vm120_vm5, %v216_v43  ;;  %122 = vadd.xlane.f32.xlu1 %v121_v44 }
 0x175   :  { %v418_v46 = vpop.f32.mrf.mxu1 }
 0x176   :  { %v221_v47 = vsel %vm586_vm6, %v220_v45, 0.0 }
 0x177   :  { %v318_v48 = vpop.f32.mrf.mxu0  ;;  %v222_v49 = vsel %vm120_vm5, %v221_v47, 0.0 }
 0x178   :  { %v322_v50 = vsub.f32 1.0, %v318_v48  ;;  %336 = vst.msk [vmem:[#allocation4 + $0x4] sm:$0x3] %vm120_vm5, %v318_v48  ;;  %223 = vadd.xlane.f32.xlu0 %v222_v49 }
 0x179   :  { %v429_v51 = vpop.f32.mrf.mxu0 }
 0x17a   :  { %v323_v52 = vsel %vm586_vm6, %v322_v50, 0.0 }
 0x17b   :  { %v324_v53 = vsel %vm120_vm5, %v323_v52, 0.0 }
 0x17c   :  { %325 = vadd.xlane.f32.xlu1 %v324_v53 }
 0x17d   :  { %472 = shalt.err (!%p469_p9)
}
 0x17e   :  { %s499_s25 = smov 32   ;;  %s500_s26 = smov 2  }
 0x17f   :  { %350 = dma.vmem_to_hbm [thread:$0]  %s345_s23, 96, %s611_s3, [#allocation5], %s499_s25, %s499_s25, %s500_s26  }
 0x180   :  { %s501_s6 = smov [#allocation7]  }
 0x1fd   :  { %v123_v54 = vpop.xlane.xlu1 %122 }
 0x1fe   :  { %v124_v55 = vrot.slane %v123_v54, 4 }
 0x200   :  { %v125_v56 = vadd.f32 %v124_v55, %v123_v54 }
 0x201   :  { %v224_v57 = vpop.xlane.xlu0 %223 }
 0x202   :  { %v126_v58 = vrot.slane %v125_v56, 2  ;;  %v225_v59 = vrot.slane %v224_v57, 4 }
 0x204   :  { %v226_v60 = vadd.f32 %v225_v59, %v224_v57  ;;  %v127_v61 = vadd.f32 %v126_v58, %v125_v56 }
 0x205   :  { %v326_v62 = vpop.xlane.xlu1 %325 }
 0x206   :  { %v227_v63 = vrot.slane %v226_v60, 2  ;;  %v327_v0 = vrot.slane %v326_v62, 4  ;;  %v128_v1 = vrot.slane %v127_v61, 1 }
 0x208   :  { %v228_v2 = vadd.f32 %v227_v63, %v226_v60  ;;  %v328_v3 = vadd.f32 %v327_v0, %v326_v62  ;;  %v129_v4 = vadd.f32 %v128_v1, %v127_v61 }
 0x20a   :  { %v329_v5 = vrot.slane %v328_v3, 2  ;;  %430 = vpush %v129_v4  ;;  %v229_v6 = vrot.slane %v228_v2, 1 }
 0x20c   :  { %v330_v7 = vadd.f32 %v329_v5, %v328_v3  ;;  %v230_v8 = vadd.f32 %v229_v6, %v228_v2 }
 0x20e   :  { %432 = vpush %v230_v8  ;;  %v331_v9 = vrot.slane %v330_v7, 1 }
 0x210   :  { %v332_v10 = vadd.f32 %v331_v9, %v330_v7 }
 0x212   :  { %434 = vpush %v332_v10 }
 0x23b   :  { %s431_s3 = spop %430 }
 0x23f   :  { %s433_s1 = spop %432 }
 0x240   :  { %s232_s29 = sadd.f32 %s433_s1, %s431_s3 }
 0x243   :  { %s435_s30 = spop %434 }
 0x244   :  { %s334_s5 = sadd.f32 %s435_s30, %s232_s29 }
 0x246   :  { %338 = sst [smem:[#allocation7]] %s334_s5 }
 0x247   :  { %358 = dma.smem_to_hbm %s501_s6, 16, %s612_s4, [#allocation6]  }
 0x248   :  { %491 = dma.done.wait [#allocation5], 96  }
 0x249   :  { %492 = vsyncadd [#allocation5], 4294967200 }
 0x24a   :  { %493 = dma.done.wait [#allocation6], 16  }
 0x24b   :  { %494 = vsyncadd [#allocation6], 4294967280 }
 0x24c   :  { %365 = sfence }
 0x24d   :  { %366 = vsyncpa [#allocation5], 1 }
 0x24e   :  { %367 = vsyncpa [#allocation6], 1 }

</bundles_post_ra>
